<compile_context>
chip_gen: v6e
topology: v6e:2x2x1
jax: 0.10.0
libtpu: 0.0.40
codegen_flags: <defaults>
</compile_context>

<pallas_src>
import functools

import jax
import jax.numpy as jnp
from jax.experimental import pallas as pl
from jax.experimental.pallas import tpu as pltpu


def _round_up(x, m):
    return (x + m - 1) // m * m


def _mmd_kernel(row_ref, col_ref, out_ref, *, sigmas, geometric,
                batch_size, tile, n_valid):
    """One (row-tile, col-tile) block of the signed MMD reduction.

    row_ref/col_ref: (tile, D) VMEM slabs of the padded `total` matrix.
    out_ref:         (1, 1) f32 accumulator (same block for all grid steps).
    """
    i = pl.program_id(0)
    j = pl.program_id(1)
    is_first = jnp.logical_and(i == 0, j == 0)
    is_last = jnp.logical_and(i == pl.num_programs(0) - 1,
                              j == pl.num_programs(1) - 1)

    @pl.when(is_first)
    def _():
        out_ref[...] = jnp.zeros_like(out_ref)

    row = row_ref[...]
    col = col_ref[...]

    # Gram tile on the MXU: contract the shared feature axis of both operands
    # (no explicit transpose), accumulate in f32.
    gram = jax.lax.dot_general(
        row, col, (((1,), (1,)), ((), ())),
        preferred_element_type=jnp.float32)                 # (tile, tile)

    row_f = row.astype(jnp.float32)
    col_f = col.astype(jnp.float32)
    rn = jnp.sum(row_f * row_f, axis=-1, keepdims=True)      # (tile, 1)
    cn = jnp.sum(col_f * col_f, axis=-1)[None, :]             # (1, tile)

    # Squared distances; clamp tiny negative values from cancellation.
    l2 = jnp.maximum(rn + cn - 2.0 * gram, 0.0)

    # Multi-sigma Gaussian kernel sum.
    if geometric:
        # sigmas are sigma_max / 2^k: one exp, then repeated squaring (VPU).
        sigma_max = max(sigmas)
        base = jnp.exp(l2 * jnp.float32(-1.0 / sigma_max))
        k_sum = base
        cur = base
        for _ in range(len(sigmas) - 1):
            cur = cur * cur            # base^(2^k) == exp(-l2 / (sigma_max/2^k))
            k_sum = k_sum + cur
    else:
        k_sum = jnp.zeros_like(l2)
        for s in sigmas:
            k_sum = k_sum + jnp.exp(l2 * jnp.float32(-1.0 / s))

    # Signed reduction: +1 for source rows, -1 for target rows, 0 for padding.
    b = batch_size
    row_idx = jax.lax.broadcasted_iota(jnp.int32, (tile, 1), 0) + i * tile
    col_idx = jax.lax.broadcasted_iota(jnp.int32, (1, tile), 1) + j * tile

    def _sign(idx):
        return jnp.where(idx < b, 1.0,
                         jnp.where(idx < n_valid, -1.0, 0.0)).astype(jnp.float32)

    signed = _sign(row_idx) * _sign(col_idx) * k_sum
    partial = jnp.sum(jnp.sum(signed, axis=1, keepdims=True),
                      axis=0, keepdims=True)                  # (1, 1)
    out_ref[...] += partial

    @pl.when(is_last)
    def _():
        out_ref[...] = out_ref[...] * jnp.float32(1.0 / (b * b))


def mmd_loss(source, target, fix_sigma=(1.0, 2.0, 4.0, 8.0, 16.0),
             kernel_mul=2.0, kernel_num=5):
    """Pallas TPU implementation of MMD_loss.forward (fix_sigma given as a list).

    kernel_mul / kernel_num are unused by the reference forward path when
    fix_sigma is provided; kept for signature parity.
    """
    del kernel_mul, kernel_num
    assert source.ndim == 2 and source.shape == target.shape
    b, d = source.shape
    n = 2 * b

    sigmas = tuple(float(s) for s in fix_sigma)
    s_desc = sorted(sigmas, reverse=True)
    geometric = all(
        abs(s_desc[0] / s - float(2 ** k)) < 1e-6 * float(2 ** k)
        for k, s in enumerate(s_desc))

    # (8,128)-aligned tile over the implicit (2B, 2B) kernel matrix; pad rows
    # of `total` so the row count divides the tile. Padded rows carry sign 0.
    tile = 256 if n >= 256 else _round_up(n, 128)
    n_pad = _round_up(n, tile)

    total = jnp.concatenate([source, target], axis=0)
    if n_pad != n:
        total = jnp.pad(total, ((0, n_pad - n), (0, 0)))

    grid = (n_pad // tile, n_pad // tile)

    kernel = functools.partial(
        _mmd_kernel, sigmas=sigmas, geometric=geometric,
        batch_size=b, tile=tile, n_valid=n)

    out = pl.pallas_call(
        kernel,
        out_shape=jax.ShapeDtypeStruct((1, 1), jnp.float32),
        grid_spec=pltpu.PrefetchScalarGridSpec(
            num_scalar_prefetch=0,
            grid=grid,
            in_specs=[
                pl.BlockSpec((tile, d), lambda i, j: (i, 0)),   # row slab
                pl.BlockSpec((tile, d), lambda i, j: (j, 0)),   # col slab
            ],
            out_specs=pl.BlockSpec((1, 1), lambda i, j: (0, 0)),
        ),
        compiler_params=pltpu.CompilerParams(
            dimension_semantics=("arbitrary", "arbitrary")),
    )(total, total)
    return out[0, 0]


def _mmd_loss_ref(source, target, fix_sigma=(1.0, 2.0, 4.0, 8.0, 16.0)):
    """Pure-JAX reference (mirrors the PyTorch module exactly)."""
    b = source.shape[0]
    total = jnp.concatenate([source, target], axis=0).astype(jnp.float32)
    diff = total[None, :, :] - total[:, None, :]
    l2 = jnp.sum(diff * diff, axis=2)
    kernels = sum(jnp.exp(-l2 / jnp.float32(s)) for s in fix_sigma)
    xx = kernels[:b, :b]
    yy = kernels[b:, b:]
    xy = kernels[:b, b:]
    yx = kernels[b:, :b]
    return jnp.mean(xx + yy - xy - yx)


if __name__ == "__main__":
    key = jax.random.PRNGKey(0)
    k1, k2, k3, k4 = jax.random.split(key, 4)

    fix_sigma = (1.0, 2.0, 4.0, 8.0, 16.0)

    # Small case (single tile; exercises row padding + sign masking).
    batch, hidden = 8, 32
    source = jax.random.normal(k1, (batch, hidden), dtype=jnp.float32)
    target = jax.random.normal(k2, (batch, hidden), dtype=jnp.float32) + 0.5

    loss = mmd_loss(source, target, fix_sigma=fix_sigma)
    jax.block_until_ready(loss)
    ref = _mmd_loss_ref(source, target, fix_sigma=fix_sigma)
    assert jnp.allclose(loss, ref, rtol=5e-4, atol=5e-4), (loss, ref)

    # Larger case exercising the 2x2 tile grid and the running accumulator.
    batch2, hidden2 = 160, 64
    source2 = jax.random.normal(k3, (batch2, hidden2), dtype=jnp.float32)
    target2 = jax.random.normal(k4, (batch2, hidden2), dtype=jnp.float32) + 0.25

    loss2 = mmd_loss(source2, target2, fix_sigma=fix_sigma)
    jax.block_until_ready(loss2)
    ref2 = _mmd_loss_ref(source2, target2, fix_sigma=fix_sigma)
    assert jnp.allclose(loss2, ref2, rtol=5e-4, atol=5e-4), (loss2, ref2)

    print("KERNEL_OK")
</pallas_src>

<mosaic_0001>
module attributes {stable_mosaic.version = 11 : i64} {
  func.func @_mmd_kernel(%arg0: i32, %arg1: i32, %arg2: memref<128x32xf32, #tpu.memory_space<vmem>>, %arg3: memref<128x32xf32, #tpu.memory_space<vmem>>, %arg4: memref<1x1xf32, #tpu.memory_space<vmem>>) attributes {dimension_semantics = [#tpu.dimension_semantics<arbitrary>, #tpu.dimension_semantics<arbitrary>], iteration_bounds = array<i64: 1, 1>, scalar_prefetch = 0 : i64, scratch_operands = 0 : i64, tpu.core_type = #tpu.core_type<tc>, window_params = [{transform_indices = @transform_0, window_bounds = array<i64: 128, 32>}, {transform_indices = @transform_1, window_bounds = array<i64: 128, 32>}, {pipeline_mode = #tpu.pipeline_mode<synchronous>, transform_indices = @transform_2, window_bounds = array<i64: 1, 1>}]} {
    %c0_i32 = arith.constant 0 : i32
    %0 = arith.cmpi eq, %arg0, %c0_i32 : i32
    %c0_i32_0 = arith.constant 0 : i32
    %1 = arith.cmpi eq, %arg1, %c0_i32_0 : i32
    %2 = arith.andi %0, %1 : i1
    %c0_i32_1 = arith.constant 0 : i32
    %3 = arith.cmpi eq, %arg0, %c0_i32_1 : i32
    %c0_i32_2 = arith.constant 0 : i32
    %4 = arith.cmpi eq, %arg1, %c0_i32_2 : i32
    %5 = arith.andi %3, %4 : i1
    %6 = arith.extui %2 : i1 to i32
    %c0_i32_3 = arith.constant 0 : i32
    %7 = arith.cmpi ne, %6, %c0_i32_3 : i32
    scf.if %7 {
      %cst_28 = arith.constant 0.000000e+00 : f32
      %75 = vector.broadcast %cst_28 : f32 to vector<1x1xf32>
      %c0_29 = arith.constant 0 : index
      %c0_30 = arith.constant 0 : index
      %76 = vector.load %arg4[%c0_29, %c0_30] : memref<1x1xf32, #tpu.memory_space<vmem>>, vector<1x1xf32>
      tpu.vector_store %arg4[%c0_29, %c0_30], %75 {strides = array<i32>} : memref<1x1xf32, #tpu.memory_space<vmem>>, vector<1x1xf32>,
    } else {
    }
    %c0 = arith.constant 0 : index
    %c0_4 = arith.constant 0 : index
    %8 = vector.load %arg2[%c0, %c0_4] : memref<128x32xf32, #tpu.memory_space<vmem>>, vector<128x32xf32>
    %c0_5 = arith.constant 0 : index
    %c0_6 = arith.constant 0 : index
    %9 = vector.load %arg3[%c0_5, %c0_6] : memref<128x32xf32, #tpu.memory_space<vmem>>, vector<128x32xf32>
    %cst = arith.constant dense<0.000000e+00> : vector<128x128xf32>
    %10 = tpu.matmul %8, %9, %cst {dimension_numbers = #tpu.dot_dimension_numbers<[1], [1], [0], [0], [0, 0, 1, 0], [], []>} : vector<128x32xf32>, vector<128x32xf32>, vector<128x128xf32> -> vector<128x128xf32>
    %11 = arith.mulf %8, %8 : vector<128x32xf32>
    %cst_7 = arith.constant dense<0.000000e+00> : vector<128xf32>
    %12 = vector.multi_reduction <add>, %11, %cst_7 [1] : vector<128x32xf32> to vector<128xf32>
    %13 = vector.shape_cast %12 : vector<128xf32> to vector<128x1xf32>
    %14 = arith.mulf %9, %9 : vector<128x32xf32>
    %cst_8 = arith.constant dense<0.000000e+00> : vector<128xf32>
    %15 = vector.multi_reduction <add>, %14, %cst_8 [1] : vector<128x32xf32> to vector<128xf32>
    %16 = vector.shape_cast %15 : vector<128xf32> to vector<1x128xf32>
    %17 = vector.broadcast %13 : vector<128x1xf32> to vector<128x128xf32>
    %18 = vector.broadcast %16 : vector<1x128xf32> to vector<128x128xf32>
    %19 = arith.addf %17, %18 : vector<128x128xf32>
    %cst_9 = arith.constant 2.000000e+00 : f32
    %20 = vector.broadcast %cst_9 : f32 to vector<128x128xf32>
    %21 = arith.mulf %20, %10 : vector<128x128xf32>
    %22 = arith.subf %19, %21 : vector<128x128xf32>
    %cst_10 = arith.constant 0.000000e+00 : f32
    %23 = vector.broadcast %cst_10 : f32 to vector<128x128xf32>
    %24 = arith.maximumf %22, %23 : vector<128x128xf32>
    %cst_11 = arith.constant -6.250000e-02 : f32
    %25 = vector.broadcast %cst_11 : f32 to vector<128x128xf32>
    %26 = arith.mulf %24, %25 : vector<128x128xf32>
    %27 = math.exp %26 : vector<128x128xf32>
    %28 = arith.mulf %27, %27 : vector<128x128xf32>
    %29 = arith.addf %27, %28 : vector<128x128xf32>
    %30 = arith.mulf %28, %28 : vector<128x128xf32>
    %31 = arith.addf %29, %30 : vector<128x128xf32>
    %32 = arith.mulf %30, %30 : vector<128x128xf32>
    %33 = arith.addf %31, %32 : vector<128x128xf32>
    %34 = arith.mulf %32, %32 : vector<128x128xf32>
    %35 = arith.addf %33, %34 : vector<128x128xf32>
    %36 = tpu.iota {dimensions = array<i32: 0>} : vector<128x1xi32>
    %c128_i32 = arith.constant 128 : i32
    %37 = arith.muli %arg0, %c128_i32 : i32
    %38 = vector.broadcast %37 : i32 to vector<128x1xi32>
    %39 = arith.addi %36, %38 : vector<128x1xi32>
    %40 = tpu.iota {dimensions = array<i32: 1>} : vector<1x128xi32>
    %c128_i32_12 = arith.constant 128 : i32
    %41 = arith.muli %arg1, %c128_i32_12 : i32
    %42 = vector.broadcast %41 : i32 to vector<1x128xi32>
    %43 = arith.addi %40, %42 : vector<1x128xi32>
    %c8_i32 = arith.constant 8 : i32
    %44 = vector.broadcast %c8_i32 : i32 to vector<128x1xi32>
    %45 = arith.cmpi slt, %39, %44 : vector<128x1xi32>
    %c16_i32 = arith.constant 16 : i32
    %46 = vector.broadcast %c16_i32 : i32 to vector<128x1xi32>
    %47 = arith.cmpi slt, %39, %46 : vector<128x1xi32>
    %cst_13 = arith.constant -1.000000e+00 : f32
    %cst_14 = arith.constant 0.000000e+00 : f32
    %48 = vector.broadcast %cst_13 : f32 to vector<128x1xf32>
    %49 = vector.broadcast %cst_14 : f32 to vector<128x1xf32>
    %50 = arith.select %47, %48, %49 : vector<128x1xi1>, vector<128x1xf32>
    %cst_15 = arith.constant 1.000000e+00 : f32
    %51 = vector.broadcast %cst_15 : f32 to vector<128x1xf32>
    %52 = arith.select %45, %51, %50 : vector<128x1xi1>, vector<128x1xf32>
    %c8_i32_16 = arith.constant 8 : i32
    %53 = vector.broadcast %c8_i32_16 : i32 to vector<1x128xi32>
    %54 = arith.cmpi slt, %43, %53 : vector<1x128xi32>
    %c16_i32_17 = arith.constant 16 : i32
    %55 = vector.broadcast %c16_i32_17 : i32 to vector<1x128xi32>
    %56 = arith.cmpi slt, %43, %55 : vector<1x128xi32>
    %cst_18 = arith.constant -1.000000e+00 : f32
    %cst_19 = arith.constant 0.000000e+00 : f32
    %57 = vector.broadcast %cst_18 : f32 to vector<1x128xf32>
    %58 = vector.broadcast %cst_19 : f32 to vector<1x128xf32>
    %59 = arith.select %56, %57, %58 : vector<1x128xi1>, vector<1x128xf32>
    %cst_20 = arith.constant 1.000000e+00 : f32
    %60 = vector.broadcast %cst_20 : f32 to vector<1x128xf32>
    %61 = arith.select %54, %60, %59 : vector<1x128xi1>, vector<1x128xf32>
    %62 = vector.broadcast %52 : vector<128x1xf32> to vector<128x128xf32>
    %63 = vector.broadcast %61 : vector<1x128xf32> to vector<128x128xf32>
    %64 = arith.mulf %62, %63 : vector<128x128xf32>
    %65 = arith.mulf %64, %35 : vector<128x128xf32>
    %cst_21 = arith.constant dense<0.000000e+00> : vector<128xf32>
    %66 = vector.multi_reduction <add>, %65, %cst_21 [1] : vector<128x128xf32> to vector<128xf32>
    %67 = vector.shape_cast %66 : vector<128xf32> to vector<128x1xf32>
    %cst_22 = arith.constant dense<0.000000e+00> : vector<1xf32>
    %68 = vector.multi_reduction <add>, %67, %cst_22 [0] : vector<128x1xf32> to vector<1xf32>
    %69 = vector.shape_cast %68 : vector<1xf32> to vector<1x1xf32>
    %c0_23 = arith.constant 0 : index
    %c0_24 = arith.constant 0 : index
    %70 = vector.load %arg4[%c0_23, %c0_24] : memref<1x1xf32, #tpu.memory_space<vmem>>, vector<1x1xf32>
    %71 = arith.addf %70, %69 : vector<1x1xf32>
    %c0_25 = arith.constant 0 : index
    %c0_26 = arith.constant 0 : index
    %72 = vector.load %arg4[%c0_25, %c0_26] : memref<1x1xf32, #tpu.memory_space<vmem>>, vector<1x1xf32>
    tpu.vector_store %arg4[%c0_25, %c0_26], %71 {strides = array<i32>} : memref<1x1xf32, #tpu.memory_space<vmem>>, vector<1x1xf32>,
    %73 = arith.extui %5 : i1 to i32
    %c0_i32_27 = arith.constant 0 : i32
    %74 = arith.cmpi ne, %73, %c0_i32_27 : i32
    scf.if %74 {
      %c0_28 = arith.constant 0 : index
      %c0_29 = arith.constant 0 : index
      %75 = vector.load %arg4[%c0_28, %c0_29] : memref<1x1xf32, #tpu.memory_space<vmem>>, vector<1x1xf32>
      %cst_30 = arith.constant 1.562500e-02 : f32
      %76 = vector.broadcast %cst_30 : f32 to vector<1x1xf32>
      %77 = arith.mulf %75, %76 : vector<1x1xf32>
      %c0_31 = arith.constant 0 : index
      %c0_32 = arith.constant 0 : index
      %78 = vector.load %arg4[%c0_31, %c0_32] : memref<1x1xf32, #tpu.memory_space<vmem>>, vector<1x1xf32>
      tpu.vector_store %arg4[%c0_31, %c0_32], %77 {strides = array<i32>} : memref<1x1xf32, #tpu.memory_space<vmem>>, vector<1x1xf32>,
    } else {
    }
    return
  }
  func.func @transform_0(%arg0: i32, %arg1: i32) -> (i32, i32) {
    %c0_i32 = arith.constant 0 : i32
    %c0_i32_0 = arith.constant 0 : i32
    return %arg0, %c0_i32 : i32, i32
  }
  func.func @transform_1(%arg0: i32, %arg1: i32) -> (i32, i32) {
    %c0_i32 = arith.constant 0 : i32
    %c0_i32_0 = arith.constant 0 : i32
    return %arg1, %c0_i32 : i32, i32
  }
  func.func @transform_2(%arg0: i32, %arg1: i32) -> (i32, i32) {
    %c0_i32 = arith.constant 0 : i32
    %c0_i32_0 = arith.constant 0 : i32
    %c0_i32_1 = arith.constant 0 : i32
    return %c0_i32, %c0_i32_0 : i32, i32
  }
}

</mosaic_0001>

<bundles_post_ra>
// kernel: tpu_custom_call.1
= control target key start
LH: loop header
LB: loop body
LE: loop exit
PB: predicated region body
PF: predicated region fallthrough
CT: control target
= control target key end

     0   :  { %vm52_vm0 = vcmask 261120   ;;  %s1730_s0 = inlined_call_operand.vmem [shape: f32[128,32], index: 0, kind: input, shape index: {}]   ;;  %s1731_s1 = inlined_call_operand.vmem [shape: f32[128,32], index: 1, kind: input, shape index: {}]   ;;  %s1732_s2 = inlined_call_operand.hbm [shape: f32[1,1], index: 2, kind: output, shape index: {}]  }
   0x1   :  { %v1244_v0 = vld [vmem:[%s1731_s1 + $0x78] sm:$0xff]  ;;  %v1249_v1 = vld [vmem:[%s1731_s1 + $0x70] sm:$0xff]  ;;  %v1266_v2 = vld [vmem:[%s1731_s1 + $0x68] sm:$0xff] }
   0x2   :  { %1080 = vmatprep.subr.msk.mxu0 %vm52_vm0, %v1244_v0  ;;  %1136 = vmatprep.subr.msk.mxu1 %vm52_vm0, %v1244_v0  ;;  %v1271_v3 = vld [vmem:[%s1731_s1 + $0x10] sm:$0xff]  ;;  %v1276_v4 = vld [vmem:[%s1731_s1] sm:$0xff]  ;;  %v1281_v5 = vld [vmem:[%s1731_s1 + $0x18] sm:$0xff] }
   0x3   :  { %1081 = vmatpush3.xpose.msk.msra.mxu0 %vm52_vm0, %v1244_v0  ;;  %1152 = vmatpush3.xpose.msk.msra.mxu1 %vm52_vm0, %v1244_v0  ;;  %v360_v6 = vmul.f32 %v1271_v3, %v1271_v3  ;;  %v358_v7 = vmul.f32 %v1276_v4, %v1276_v4  ;;  %v361_v8 = vmul.f32 %v1281_v5, %v1281_v5  ;;  %v1292_v9 = vld [vmem:[%s1731_s1 + $0x8] sm:$0xff]  ;;  %v1303_v11 = vld [vmem:[%s1730_s0] sm:$0xff] }
   0x4   :  { %1082 = vmatprep.subr.msk.mxu0 %vm52_vm0, %v1249_v1  ;;  %1137 = vmatprep.subr.msk.mxu1 %vm52_vm0, %v1249_v1  ;;  %v359_v10 = vmul.f32 %v1292_v9, %v1292_v9  ;;  %v1308_v12 = vld [vmem:[%s1730_s0 + $0x40] sm:$0xff]  ;;  %v1322_v16 = vld [vmem:[%s1731_s1 + $0x28] sm:$0xff] }
   0x5   :  { %v380_v13 = vsel %vm52_vm0, %v360_v6, 0.0  ;;  %v374_v14 = vsel %vm52_vm0, %v358_v7, 0.0  ;;  %v48_v15 = vld [vmem:[%s1731_s1 + $0x60] sm:$0xff]  ;;  %v383_v18 = vsel %vm52_vm0, %v361_v8, 0.0  ;;  %v363_v20 = vmul.f32 %v1322_v16, %v1322_v16  ;;  %1112 = vmatprep.mubr.msk.f32.mxu0 %vm52_vm0, %v1303_v11  ;;  %1124 = vmatprep.mubr.msk.f32.mxu1 %vm52_vm0, %v1308_v12 }
   0x6   :  { %v1327_v17 = vld [vmem:[%s1731_s1 + $0x20] sm:$0xff]  ;;  %381 = vadd.xlane.f32.xlu1 %v380_v13  ;;  %375 = vadd.xlane.f32.xlu0 %v374_v14  ;;  %v377_v19 = vsel %vm52_vm0, %v359_v10, 0.0 }
   0x7   :  { %1083 = vmatpush3.xpose.msk.msra.mxu0 %vm52_vm0, %v1249_v1  ;;  %1153 = vmatpush3.xpose.msk.msra.mxu1 %vm52_vm0, %v1249_v1  ;;  %v362_v21 = vmul.f32 %v1327_v17, %v1327_v17 }
   0x8   :  { %1084 = vmatprep.subr.msk.mxu0 %vm52_vm0, %v1266_v2  ;;  %1138 = vmatprep.subr.msk.mxu1 %vm52_vm0, %v1266_v2 }
   0xb   :  { %1085 = vmatpush3.xpose.msk.msra.mxu0 %vm52_vm0, %v1266_v2  ;;  %1154 = vmatpush3.xpose.msk.msra.mxu1 %vm52_vm0, %v1266_v2 }
   0xc   :  { %1086 = vmatprep.subr.msk.mxu0 %vm52_vm0, %v48_v15  ;;  %1139 = vmatprep.subr.msk.mxu1 %vm52_vm0, %v48_v15 }
   0xd   :  { %7 = vsyncpa [#allocation3], 0  ;;  %v47_v22 = vld [vmem:[%s1731_s1 + $0x58] sm:$0xff]  ;;  %v1356_v24 = vld [vmem:[%s1731_s1 + $0x30] sm:$0xff]  ;;  %384 = vadd.xlane.f32.xlu1 %v383_v18  ;;  %378 = vadd.xlane.f32.xlu0 %v377_v19  ;;  %v389_v25 = vsel %vm52_vm0, %v363_v20, 0.0  ;;  %v386_v26 = vsel %vm52_vm0, %v362_v21, 0.0  ;;  %v371_v42 = vmul.f32 %v1266_v2, %v1266_v2  ;;  %v370_v43 = vmul.f32 %v48_v15, %v48_v15 }
   0xe   :  { %v1351_v23 = vld [vmem:[%s1731_s1 + $0x38] sm:$0xff]  ;;  %v364_v28 = vmul.f32 %v1356_v24, %v1356_v24  ;;  %v46_v29 = vld [vmem:[%s1731_s1 + $0x50] sm:$0xff]  ;;  %v45_v30 = vld [vmem:[%s1731_s1 + $0x48] sm:$0xff]  ;;  %v369_v38 = vmul.f32 %v47_v22, %v47_v22  ;;  %v373_v46 = vmul.f32 %v1244_v0, %v1244_v0  ;;  %v372_v47 = vmul.f32 %v1249_v1, %v1249_v1 }
   0xf   :  { %v365_v27 = vmul.f32 %v1351_v23, %v1351_v23  ;;  %1087 = vmatpush3.xpose.msk.msra.mxu0 %vm52_vm0, %v48_v15  ;;  %1155 = vmatpush3.xpose.msk.msra.mxu1 %vm52_vm0, %v48_v15  ;;  %v44_v31 = vld [vmem:[%s1731_s1 + $0x40] sm:$0xff]  ;;  %v367_v34 = vmul.f32 %v45_v30, %v45_v30  ;;  %v368_v39 = vmul.f32 %v46_v29, %v46_v29  ;;  %v413_v44 = vsel %vm52_vm0, %v371_v42, 0.0  ;;  %v1412_v48 = vld [vmem:[%s1730_s0 + $0x8] sm:$0xff]  ;;  %v1431_v53 = vld [vmem:[%s1730_s0 + $0x10] sm:$0xff] }
  0x10   :  { %1088 = vmatprep.subr.msk.mxu0 %vm52_vm0, %v47_v22  ;;  %1140 = vmatprep.subr.msk.mxu1 %vm52_vm0, %v47_v22  ;;  %v392_v33 = vsel %vm52_vm0, %v364_v28, 0.0  ;;  %v366_v35 = vmul.f32 %v44_v31, %v44_v31  ;;  %v407_v40 = vsel %vm52_vm0, %v369_v38, 0.0  ;;  %v410_v45 = vsel %vm52_vm0, %v370_v43, 0.0  ;;  %v1436_v54 = vld [vmem:[%s1730_s0 + $0x18] sm:$0xff]  ;;  %v1455_v59 = vld [vmem:[%s1730_s0 + $0x20] sm:$0xff]  ;;  %v1460_v60 = vld [vmem:[%s1730_s0 + $0x28] sm:$0xff] }
  0x11   :  { %390 = vadd.xlane.f32.xlu1 %v389_v25  ;;  %387 = vadd.xlane.f32.xlu0 %v386_v26  ;;  %v395_v32 = vsel %vm52_vm0, %v365_v27, 0.0  ;;  %v401_v36 = vsel %vm52_vm0, %v367_v34, 0.0  ;;  %v404_v41 = vsel %vm52_vm0, %v368_v39, 0.0  ;;  %v294_v49 = vmul.f32 %v1303_v11, %v1303_v11  ;;  %v1479_v1 = vld [vmem:[%s1730_s0 + $0x30] sm:$0xff]  ;;  %v1484_v2 = vld [vmem:[%s1730_s0 + $0x38] sm:$0xff]  ;;  %v29_v11 = vld [vmem:[%s1730_s0 + $0x48] sm:$0xff] }
  0x12   :  { %v398_v37 = vsel %vm52_vm0, %v366_v35, 0.0  ;;  %v419_v50 = vsel %vm52_vm0, %v373_v46, 0.0  ;;  %v416_v51 = vsel %vm52_vm0, %v372_v47, 0.0  ;;  %v295_v52 = vmul.f32 %v1412_v48, %v1412_v48  ;;  %v32_v21 = vld [vmem:[%s1730_s0 + $0x60] sm:$0xff]  ;;  %v34_v26 = vld [vmem:[%s1730_s0 + $0x70] sm:$0xff]  ;;  %v35_v27 = vld [vmem:[%s1730_s0 + $0x78] sm:$0xff] }
  0x13   :  { %1089 = vmatpush3.xpose.msk.msra.mxu0 %vm52_vm0, %v47_v22  ;;  %1156 = vmatpush3.xpose.msk.msra.mxu1 %vm52_vm0, %v47_v22  ;;  %v310_v56 = vsel %vm52_vm0, %v294_v49, 0.0  ;;  %v297_v57 = vmul.f32 %v1436_v54, %v1436_v54  ;;  %v296_v58 = vmul.f32 %v1431_v53, %v1431_v53  ;;  %v299_v63 = vmul.f32 %v1460_v60, %v1460_v60  ;;  %v33_v22 = vld [vmem:[%s1730_s0 + $0x68] sm:$0xff] }
  0x14   :  { %1090 = vmatprep.subr.msk.mxu0 %vm52_vm0, %v46_v29  ;;  %1141 = vmatprep.subr.msk.mxu1 %vm52_vm0, %v46_v29  ;;  %v313_v55 = vsel %vm52_vm0, %v295_v52, 0.0  ;;  %v298_v0 = vmul.f32 %v1455_v59, %v1455_v59  ;;  %v301_v8 = vmul.f32 %v1484_v2, %v1484_v2  ;;  %v300_v10 = vmul.f32 %v1479_v1, %v1479_v1 }
  0x15   :  { %396 = vadd.xlane.f32.xlu1 %v395_v32  ;;  %393 = vadd.xlane.f32.xlu0 %v392_v33  ;;  %v319_v61 = vsel %vm52_vm0, %v297_v57, 0.0  ;;  %v316_v62 = vsel %vm52_vm0, %v296_v58, 0.0  ;;  %v325_v6 = vsel %vm52_vm0, %v299_v63, 0.0  ;;  %v302_v13 = vmul.f32 %v1308_v12, %v1308_v12  ;;  %v30_v12 = vld [vmem:[%s1730_s0 + $0x50] sm:$0xff] }
  0x16   :  { %v322_v7 = vsel %vm52_vm0, %v298_v0, 0.0  ;;  %v331_v14 = vsel %vm52_vm0, %v301_v8, 0.0  ;;  %v328_v15 = vsel %vm52_vm0, %v300_v10, 0.0  ;;  %v304_v20 = vmul.f32 %v30_v12, %v30_v12 }
  0x17   :  { %1091 = vmatpush3.xpose.msk.msra.mxu0 %vm52_vm0, %v46_v29  ;;  %1157 = vmatpush3.xpose.msk.msra.mxu1 %vm52_vm0, %v46_v29  ;;  %v306_v25 = vmul.f32 %v32_v21, %v32_v21  ;;  %v309_v29 = vmul.f32 %v35_v27, %v35_v27  ;;  %v438_v39 = vlaneseq  ;;  %vm449_vm1 = vcmask 130112  }
  0x18   :  { %1092 = vmatprep.subr.msk.mxu0 %vm52_vm0, %v45_v30  ;;  %1142 = vmatprep.subr.msk.mxu1 %vm52_vm0, %v45_v30  ;;  %vm456_vm2 = vcmask 195712   ;;  %vm463_vm3 = vcmask 261312   ;;  %vm470_vm4 = vcmask 326912   ;;  %vm477_vm5 = vcmask 392512  }
  0x19   :  { %402 = vadd.xlane.f32.xlu1 %v401_v36  ;;  %399 = vadd.xlane.f32.xlu0 %v398_v37  ;;  %v1584_v43 = vshrl.u32 %v438_v39, 7  ;;  %vm484_vm6 = vcmask 458112   ;;  %vm491_vm7 = vcmask 523712   ;;  %vm498_vm8 = vcmask 589312  }
  0x1a   :  { %vm505_vm9 = vcmask 654912   ;;  %vm512_vm10 = vcmask 720512   ;;  %vm519_vm11 = vcmask 786112   ;;  %vm526_vm12 = vcmask 851712  }
  0x1b   :  { %1093 = vmatpush3.xpose.msk.msra.mxu0 %vm52_vm0, %v45_v30  ;;  %1158 = vmatpush3.xpose.msk.msra.mxu1 %vm52_vm0, %v45_v30  ;;  %v308_v30 = vmul.f32 %v34_v26, %v34_v26  ;;  %vm533_vm13 = vcmask 917312   ;;  %vm540_vm14 = vcmask 982912   ;;  %vm547_vm15 = vcmask 1048512  }
  0x1c   :  { %1094 = vmatprep.subr.msk.mxu0 %vm52_vm0, %v44_v31  ;;  %1143 = vmatprep.subr.msk.mxu1 %vm52_vm0, %v44_v31 }
  0x1d   :  { %408 = vadd.xlane.f32.xlu1 %v407_v40  ;;  %405 = vadd.xlane.f32.xlu0 %v404_v41  ;;  %v352_v32 = vsel %vm52_vm0, %v308_v30, 0.0  ;;  %v1582_v41 = vand.u32 127, %v438_v39 }
  0x1f   :  { %1095 = vmatpush3.xpose.msk.msra.mxu0 %vm52_vm0, %v44_v31  ;;  %1159 = vmatpush3.xpose.msk.msra.mxu1 %vm52_vm0, %v44_v31  ;;  %v355_v31 = vsel %vm52_vm0, %v309_v29, 0.0  ;;  %v451_v47 = vadd.s32 4294967280, %v1582_v41  ;;  %v486_v10 = vadd.s32 4294967240, %v1582_v41 }
  0x20   :  { %1096 = vmatprep.subr.msk.mxu0 %vm52_vm0, %v1351_v23  ;;  %1144 = vmatprep.subr.msk.mxu1 %vm52_vm0, %v1351_v23 }
  0x21   :  { %414 = vadd.xlane.f32.xlu1 %v413_v44  ;;  %411 = vadd.xlane.f32.xlu0 %v410_v45  ;;  %v444_v44 = vadd.s32 4294967288, %v1582_v41  ;;  %v454_v52 = vsub.s32 %v451_v47, %v1584_v43 }
  0x23   :  { %1097 = vmatpush3.xpose.msk.msra.mxu0 %vm52_vm0, %v1351_v23  ;;  %1160 = vmatpush3.xpose.msk.msra.mxu1 %vm52_vm0, %v1351_v23  ;;  %v447_v49 = vsub.s32 %v444_v44, %v1584_v43 }
  0x24   :  { %1098 = vmatprep.subr.msk.mxu0 %vm52_vm0, %v1356_v24  ;;  %1145 = vmatprep.subr.msk.mxu1 %vm52_vm0, %v1356_v24 }
  0x25   :  { %420 = vadd.xlane.f32.xlu1 %v419_v50  ;;  %417 = vadd.xlane.f32.xlu0 %v416_v51  ;;  %v458_v50 = vadd.s32 4294967272, %v1582_v41 }
  0x27   :  { %1099 = vmatpush3.xpose.msk.msra.mxu0 %vm52_vm0, %v1356_v24  ;;  %1161 = vmatpush3.xpose.msk.msra.mxu1 %vm52_vm0, %v1356_v24  ;;  %v307_v24 = vmul.f32 %v33_v22, %v33_v22  ;;  %v461_v57 = vsub.s32 %v458_v50, %v1584_v43 }
  0x28   :  { %1100 = vmatprep.subr.msk.mxu0 %vm52_vm0, %v1322_v16  ;;  %1146 = vmatprep.subr.msk.mxu1 %vm52_vm0, %v1322_v16 }
  0x29   :  { %314 = vadd.xlane.f32.xlu1 %v313_v55  ;;  %311 = vadd.xlane.f32.xlu0 %v310_v56  ;;  %v349_v28 = vsel %vm52_vm0, %v307_v24, 0.0  ;;  %v465_v56 = vadd.s32 4294967264, %v1582_v41  ;;  %v507_v24 = vadd.s32 4294967216, %v1582_v41 }
  0x2b   :  { %1101 = vmatpush3.xpose.msk.msra.mxu0 %vm52_vm0, %v1322_v16  ;;  %1162 = vmatpush3.xpose.msk.msra.mxu1 %vm52_vm0, %v1322_v16  ;;  %v303_v16 = vmul.f32 %v29_v11, %v29_v11  ;;  %v510_v29 = vsub.s32 %v507_v24, %v1584_v43 }
  0x2c   :  { %1102 = vmatprep.subr.msk.mxu0 %vm52_vm0, %v1327_v17  ;;  %1147 = vmatprep.subr.msk.mxu1 %vm52_vm0, %v1327_v17 }
  0x2d   :  { %320 = vadd.xlane.f32.xlu1 %v319_v61  ;;  %317 = vadd.xlane.f32.xlu0 %v316_v62  ;;  %v337_v18 = vsel %vm52_vm0, %v303_v16, 0.0  ;;  %v468_v62 = vsub.s32 %v465_v56, %v1584_v43 }
  0x2f   :  { %1103 = vmatpush3.xpose.msk.msra.mxu0 %vm52_vm0, %v1327_v17  ;;  %1163 = vmatpush3.xpose.msk.msra.mxu1 %vm52_vm0, %v1327_v17  ;;  %v31_v17 = vld [vmem:[%s1730_s0 + $0x58] sm:$0xff]  ;;  %s1225_s0 = smov [#allocation2]  }
  0x30   :  { %1104 = vmatprep.subr.msk.mxu0 %vm52_vm0, %v1281_v5  ;;  %1148 = vmatprep.subr.msk.mxu1 %vm52_vm0, %v1281_v5  ;;  %v305_v19 = vmul.f32 %v31_v17, %v31_v17  ;;  %s1008_s16 = sshll.u32 %s1225_s0, 4  ;;  %s1009_s16 = int_to_ptr.vmem [resolvable:$true] %s1008_s16 }
  0x31   :  { %326 = vadd.xlane.f32.xlu1 %v325_v6  ;;  %323 = vadd.xlane.f32.xlu0 %v322_v7  ;;  %s1202_s1 = scalar_lea.vmem %s1009_s16, 16  ;;  %s1206_s17 = scalar_lea.vmem %s1009_s16, 32 }
  0x32   :  { %v343_v23 = vsel %vm52_vm0, %v305_v19, 0.0  ;;  %v500_v19 = vadd.s32 4294967224, %v1582_v41  ;;  %p1203_p0 = scmp.ne.s32.totalorder %s1009_s16, %s1202_s1  ;;  %p1207_p1 = scmp.lt.s32.totalorder %s1009_s16, %s1009_s16 }
  0x33   :  { %1105 = vmatpush3.xpose.msk.msra.mxu0 %vm52_vm0, %v1281_v5  ;;  %1164 = vmatpush3.xpose.msk.msra.mxu1 %vm52_vm0, %v1281_v5  ;;  %v334_v5 = vsel %vm52_vm0, %v302_v13, 0.0  ;;  %p1208_p2 = scmp.lt.s32.totalorder %s1206_s17, %s1202_s1 }
  0x34   :  { %1106 = vmatprep.subr.msk.mxu0 %vm52_vm0, %v1271_v3  ;;  %1149 = vmatprep.subr.msk.mxu1 %vm52_vm0, %v1271_v3 }
  0x35   :  { %332 = vadd.xlane.f32.xlu1 %v331_v14  ;;  %329 = vadd.xlane.f32.xlu0 %v328_v15  ;;  %p1209_p3 = por %p1208_p2, %p1207_p1 }
  0x37   :  { %1107 = vmatpush3.xpose.msk.msra.mxu0 %vm52_vm0, %v1271_v3  ;;  %1165 = vmatpush3.xpose.msk.msra.mxu1 %vm52_vm0, %v1271_v3  ;;  %v340_v3 = vsel %vm52_vm0, %v304_v20, 0.0  ;;  %p1210_p4 = pnand %p1209_p3, %p1203_p0 }
  0x38   :  { %1108 = vmatprep.subr.msk.mxu0 %vm52_vm0, %v1292_v9  ;;  %1150 = vmatprep.subr.msk.mxu1 %vm52_vm0, %v1292_v9 }
  0x39   :  { %338 = vadd.xlane.f32.xlu1 %v337_v18  ;;  %335 = vadd.xlane.f32.xlu0 %v334_v5 }
  0x3b   :  { %1109 = vmatpush3.xpose.msk.msra.mxu0 %vm52_vm0, %v1292_v9  ;;  %1166 = vmatpush3.xpose.msk.msra.mxu1 %vm52_vm0, %v1292_v9  ;;  %v346_v9 = vsel %vm52_vm0, %v306_v25, 0.0  ;;  %v503_v25 = vsub.s32 %v500_v19, %v1584_v43 }
  0x3c   :  { %1110 = vmatprep.subr.msk.mxu0 %vm52_vm0, %v1276_v4  ;;  %1151 = vmatprep.subr.msk.mxu1 %vm52_vm0, %v1276_v4 }
  0x3d   :  { %344 = vadd.xlane.f32.xlu1 %v343_v23  ;;  %341 = vadd.xlane.f32.xlu0 %v340_v3 }
  0x3f   :  { %1111 = vmatpush3.xpose.msk.msra.mxu0 %vm52_vm0, %v1276_v4  ;;  %1167 = vmatpush3.xpose.msk.msra.mxu1 %vm52_vm0, %v1276_v4 }
  0x41   :  { %350 = vadd.xlane.f32.xlu1 %v349_v28  ;;  %347 = vadd.xlane.f32.xlu0 %v346_v9  ;;  %v514_v28 = vadd.s32 4294967208, %v1582_v41 }
  0x42   :  { %1113 = vmatmul.mubr.msk.f32.vlgmr.msra.gmra.mxu0 %vm52_vm0, %v1412_v48  ;;  %1125 = vmatmul.mubr.msk.f32.vlgmr.msra.gmra.mxu1 %vm52_vm0, %v29_v11  ;;  %v442_v48 = vsub.s32 %v1582_v41, %v1584_v43 }
  0x43   :  { %1115 = vmatprep.mubr.msk.f32.mxu0 %vm52_vm0, %v1431_v53  ;;  %1127 = vmatprep.mubr.msk.f32.mxu1 %vm52_vm0, %v30_v12  ;;  %v493_v12 = vadd.s32 4294967232, %v1582_v41 }
  0x45   :  { %356 = vadd.xlane.f32.xlu1 %v355_v31  ;;  %353 = vadd.xlane.f32.xlu0 %v352_v32 }
  0x46   :  { %1116 = vmatmul.mubr.msk.f32.gmra.mxu0 %vm52_vm0, %v1436_v54  ;;  %1128 = vmatmul.mubr.msk.f32.gmra.mxu1 %vm52_vm0, %v31_v17  ;;  %v489_v17 = vsub.s32 %v486_v10, %v1584_v43 }
  0x47   :  { %1118 = vmatprep.mubr.msk.f32.mxu0 %vm52_vm0, %v1455_v59  ;;  %1130 = vmatprep.mubr.msk.f32.mxu1 %vm52_vm0, %v32_v21  ;;  %v496_v21 = vsub.s32 %v493_v12, %v1584_v43 }
  0x4a   :  { %1119 = vmatmul.mubr.msk.f32.gmra.mxu0 %vm52_vm0, %v1460_v60  ;;  %1131 = vmatmul.mubr.msk.f32.gmra.mxu1 %vm52_vm0, %v33_v22  ;;  %v472_v60 = vadd.s32 4294967256, %v1582_v41 }
  0x4b   :  { %1121 = vmatprep.mubr.msk.f32.mxu0 %vm52_vm0, %v1479_v1  ;;  %1133 = vmatprep.mubr.msk.f32.mxu1 %vm52_vm0, %v34_v26 }
  0x4c   :  { %v475_v6 = vsub.s32 %v472_v60, %v1584_v43 }
  0x4e   :  { %1122 = vmatmul.mubr.msk.f32.gmra.mxu0 %vm52_vm0, %v1484_v2  ;;  %1134 = vmatmul.mubr.msk.f32.gmra.mxu1 %vm52_vm0, %v35_v27  ;;  %v479_v2 = vadd.s32 4294967248, %v1582_v41  ;;  %vm905_vm0 = vcmp.lt.s32.totalorder %v1582_v41, 16 }
  0x50   :  { %v482_v13 = vsub.s32 %v479_v2, %v1584_v43 }
  0x8f   :  { %v382_v4 = vpop.xlane.xlu1 %381  ;;  %v376_v34 = vpop.xlane.xlu0 %375 }
  0x90   :  { %v443_v53 = vrot.slane %v376_v34, %v442_v48  ;;  %v455_v58 = vrot.slane %v382_v4, %v454_v52  ;;  %v521_v4 = vadd.s32 4294967200, %v1582_v41 }
  0x96   :  { %v385_v33 = vpop.xlane.xlu1 %384  ;;  %v379_v36 = vpop.xlane.xlu0 %378 }
  0x97   :  { %v448_v54 = vrot.slane %v379_v36, %v447_v49  ;;  %v462_v63 = vrot.slane %v385_v33, %v461_v57  ;;  %v517_v33 = vsub.s32 %v514_v28, %v1584_v43  ;;  %v528_v36 = vadd.s32 4294967192, %v1582_v41 }
  0x98   :  { %v542_v49 = vadd.s32 4294967176, %v1582_v41 }
  0x99   :  { %v450_v59 = vsel %vm449_vm1, %v448_v54, %v443_v53  ;;  %vm904_vm1 = vcmp.lt.s32.totalorder %v1582_v41, 8 }
  0x9a   :  { %v391_v35 = vpop.xlane.xlu1 %390  ;;  %v388_v38 = vpop.xlane.xlu0 %387  ;;  %v457_v1 = vsel %vm456_vm2, %v455_v58, %v450_v59  ;;  %vm18_vm2 = vcmask 0  }
  0x9b   :  { %v469_v7 = vrot.slane %v388_v38, %v468_v62  ;;  %v464_v8 = vsel %vm463_vm3, %v462_v63, %v457_v1  ;;  %v476_v14 = vrot.slane %v391_v35, %v475_v6  ;;  %v524_v38 = vsub.s32 %v521_v4, %v1584_v43 }
  0x9d   :  { %v471_v16 = vsel %vm470_vm4, %v469_v7, %v464_v8  ;;  %v1224_v8 = vmov 0.0  }
  0x9e   :  { %v397_v37 = vpop.xlane.xlu1 %396  ;;  %v394_v42 = vpop.xlane.xlu0 %393  ;;  %v478_v5 = vsel %vm477_vm5, %v476_v14, %v471_v16  ;;  %19 = vst.msk [vmem:[#allocation2] sm:$0x1] %vm18_vm2, %v1224_v8 }
  0x9f   :  { %v483_v18 = vrot.slane %v394_v42, %v482_v13  ;;  %v490_v22 = vrot.slane %v397_v37, %v489_v17 }
  0xa1   :  { %v485_v3 = vsel %vm484_vm6, %v483_v18, %v478_v5 }
  0xa2   :  { %v403_v40 = vpop.xlane.xlu1 %402  ;;  %v400_v46 = vpop.xlane.xlu0 %399  ;;  %v492_v27 = vsel %vm491_vm7, %v490_v22, %v485_v3 }
  0xa3   :  { %v497_v26 = vrot.slane %v400_v46, %v496_v21  ;;  %v504_v30 = vrot.slane %v403_v40, %v503_v25  ;;  %v535_v40 = vadd.s32 4294967184, %v1582_v41  ;;  %v531_v46 = vsub.s32 %v528_v36, %v1584_v43 }
  0xa5   :  { %v499_v32 = vsel %vm498_vm8, %v497_v26, %v492_v27  ;;  %v538_v52 = vsub.s32 %v535_v40, %v1584_v43 }
  0xa6   :  { %v1587_v45 = vpop.xlane.xlu1 %408  ;;  %v406_v55 = vpop.xlane.xlu0 %405  ;;  %v506_v35 = vsel %vm505_vm9, %v504_v30, %v499_v32 }
  0xa7   :  { %v511_v34 = vrot.slane %v406_v55, %v510_v29  ;;  %v518_v39 = vrot.slane %v1587_v45, %v517_v33  ;;  %v545_v45 = vsub.s32 %v542_v49, %v1584_v43 }
  0xa9   :  { %v513_v44 = vsel %vm512_vm10, %v511_v34, %v506_v35 }
  0xaa   :  { %v1594_v51 = vpop.xlane.xlu1 %414  ;;  %v412_v0 = vpop.xlane.xlu0 %411  ;;  %v520_v48 = vsel %vm519_vm11, %v518_v39, %v513_v44 }
  0xab   :  { %v525_v47 = vrot.slane %v412_v0, %v524_v38  ;;  %v532_v53 = vrot.slane %v1594_v51, %v531_v46 }
  0xad   :  { %v527_v55 = vsel %vm526_vm12, %v525_v47, %v520_v48 }
  0xae   :  { %v1600_v61 = vpop.xlane.xlu1 %420  ;;  %v418_v15 = vpop.xlane.xlu0 %417  ;;  %v534_v57 = vsel %vm533_vm13, %v532_v53, %v527_v55 }
  0xaf   :  { %v539_v56 = vrot.slane %v418_v15, %v538_v52  ;;  %v546_v59 = vrot.slane %v1600_v61, %v545_v45  ;;  %v1637_v61 = vsel %vm905_vm0, -1.0, %v1224_v8 }
  0xb1   :  { %v541_v62 = vsel %vm540_vm14, %v539_v56, %v534_v57 }
  0xb2   :  { %v1606_v11 = vpop.xlane.xlu1 %314  ;;  %v312_v23 = vpop.xlane.xlu0 %311  ;;  %v1629_v63 = vsel %vm547_vm15, %v546_v59, %v541_v62 }
  0xb3   :  { %v563_v1 = vadd.f32 %v1629_v63, %v1606_v11  ;;  %v562_v43 = vadd.f32 %v1629_v63, %v312_v23 }
  0xb6   :  { %v321_v20 = vpop.xlane.xlu1 %320  ;;  %v318_v31 = vpop.xlane.xlu0 %317 }
  0xb7   :  { %v565_v2 = vadd.f32 %v1629_v63, %v321_v20  ;;  %v564_v10 = vadd.f32 %v1629_v63, %v318_v31 }
  0xba   :  { %v327_v9 = vpop.xlane.xlu1 %326  ;;  %v324_v42 = vpop.xlane.xlu0 %323 }
  0xbb   :  { %v1642_v16 = vadd.f32 %v1629_v63, %v327_v9  ;;  %v1645_v11 = vadd.f32 %v1629_v63, %v324_v42 }
  0xbe   :  { %v333_v37 = vpop.xlane.xlu1 %332  ;;  %v330_v54 = vpop.xlane.xlu0 %329 }
  0xbf   :  { %v1648_v12 = vadd.f32 %v1629_v63, %v333_v37  ;;  %v1652_v3 = vadd.f32 %v1629_v63, %v330_v54 }
  0xc2   :  { %v339_v50 = vpop.xlane.xlu1 %338  ;;  %v336_v60 = vpop.xlane.xlu0 %335 }
  0xc3   :  { %v571_v13 = vadd.f32 %v1629_v63, %v339_v50  ;;  %v570_v17 = vadd.f32 %v1629_v63, %v336_v60 }
  0xc6   :  { %v345_v58 = vpop.xlane.xlu1 %344  ;;  %v342_v51 = vpop.xlane.xlu0 %341 }
  0xc7   :  { %v573_v24 = vadd.f32 %v1629_v63, %v345_v58  ;;  %v572_v25 = vadd.f32 %v1629_v63, %v342_v51 }
  0xca   :  { %v351_v0 = vpop.xlane.xlu1 %350  ;;  %v348_v9 = vpop.xlane.xlu0 %347 }
  0xcb   :  { %v1657_v26 = vadd.f32 %v1629_v63, %v351_v0  ;;  %v1660_v4 = vadd.f32 %v1629_v63, %v348_v9 }
  0xce   :  { %v357_v19 = vpop.xlane.xlu1 %356 }
  0xcf   :  { %v1663_v33 = vadd.f32 %v1629_v63, %v357_v19 }
 0x102   :  { %v1114_v6 = vpop.f32.mrf.mxu0  ;;  %v1126_v7 = vpop.f32.mrf.mxu1 }
 0x103   :  { %v579_v14 = vmul.f32 2.0, %v1114_v6  ;;  %v587_v15 = vmul.f32 2.0, %v1126_v7 }
 0x104   :  { %v215_v18 = vpop.f32.mrf.mxu0  ;;  %v255_v5 = vpop.f32.mrf.mxu1 }
 0x105   :  { %v595_v20 = vsub.f32 %v563_v1, %v579_v14  ;;  %v603_v21 = vsub.f32 %v571_v13, %v587_v15  ;;  %v578_v22 = vmul.f32 2.0, %v215_v18  ;;  %v586_v23 = vmul.f32 2.0, %v255_v5 }
 0x106   :  { %v1117_v27 = vpop.f32.mrf.mxu0  ;;  %v1129_v28 = vpop.f32.mrf.mxu1 }
 0x107   :  { %v611_v29 = vmax.f32 %v595_v20, 0.0  ;;  %v619_v30 = vmax.f32 %v603_v21, 0.0  ;;  %v594_v31 = vsub.f32 %v562_v43, %v578_v22  ;;  %v602_v32 = vsub.f32 %v570_v17, %v586_v23 }
 0x108   :  { %v581_v34 = vmul.f32 2.0, %v1117_v27  ;;  %v589_v35 = vmul.f32 2.0, %v1129_v28  ;;  %v225_v36 = vpop.f32.mrf.mxu0  ;;  %v265_v37 = vpop.f32.mrf.mxu1 }
 0x109   :  { %v627_v38 = vmul.f32 -0.0625, %v611_v29  ;;  %v635_v39 = vmul.f32 -0.0625, %v619_v30  ;;  %v610_v42 = vmax.f32 %v594_v31, 0.0  ;;  %v618_v44 = vmax.f32 %v602_v32, 0.0 }
 0x10a   :  { %v597_v40 = vsub.f32 %v565_v2, %v581_v34  ;;  %v605_v46 = vsub.f32 %v573_v24, %v589_v35  ;;  %v580_v47 = vmul.f32 2.0, %v225_v36  ;;  %v588_v48 = vmul.f32 2.0, %v265_v37  ;;  %v1120_v49 = vpop.f32.mrf.mxu0  ;;  %v1132_v50 = vpop.f32.mrf.mxu1 }
 0x10b   :  { %v644_v52 = vmul.f32 1.442695, %v627_v38  ;;  %v660_v53 = vmul.f32 1.442695, %v635_v39  ;;  %v626_v54 = vmul.f32 -0.0625, %v610_v42  ;;  %v634_v55 = vmul.f32 -0.0625, %v618_v44 }
 0x10c   :  { %v613_v45 = vmax.f32 %v597_v40, 0.0  ;;  %v621_v56 = vmax.f32 %v605_v46, 0.0  ;;  %v596_v57 = vsub.f32 %v564_v10, %v580_v47  ;;  %v604_v58 = vsub.f32 %v572_v25, %v588_v48  ;;  %v235_v59 = vpop.f32.mrf.mxu0  ;;  %v275_v60 = vpop.f32.mrf.mxu1 }
 0x10d   :  { %1170 = vpow2.f32 %v644_v52  ;;  %v642_v62 = vmul.f32 1.442695, %v626_v54  ;;  %v658_v0 = vmul.f32 1.442695, %v634_v55  ;;  %v583_v51 = vmul.f32 2.0, %v1120_v49  ;;  %v354_v10 = vpop.xlane.xlu0 %353 }
 0x10e   :  { %1172 = vpow2.f32 %v660_v53  ;;  %v629_v1 = vmul.f32 -0.0625, %v613_v45  ;;  %v637_v43 = vmul.f32 -0.0625, %v621_v56  ;;  %v612_v2 = vmax.f32 %v596_v57, 0.0  ;;  %v1123_v14 = vpop.f32.mrf.mxu0  ;;  %v1135_v5 = vpop.f32.mrf.mxu1 }
 0x10f   :  { %1174 = vpow2.f32 %v642_v62  ;;  %v620_v6 = vmax.f32 %v604_v58, 0.0  ;;  %v599_v7 = vsub.f32 %v1642_v16, %v583_v51  ;;  %v591_v13 = vmul.f32 2.0, %v1132_v50 }
 0x110   :  { %1176 = vpow2.f32 %v658_v0  ;;  %v648_v15 = vmul.f32 1.442695, %v629_v1  ;;  %v664_v17 = vmul.f32 1.442695, %v637_v43  ;;  %v628_v18 = vmul.f32 -0.0625, %v612_v2  ;;  %v245_v9 = vpop.f32.mrf.mxu0  ;;  %v285_v32 = vpop.f32.mrf.mxu1 }
 0x111   :  { %v636_v19 = vmul.f32 -0.0625, %v620_v6  ;;  %v615_v20 = vmax.f32 %v599_v7, 0.0  ;;  %v607_v21 = vsub.f32 %v1657_v26, %v591_v13  ;;  %v582_v22 = vmul.f32 2.0, %v235_v59 }
 0x112   :  { %1178 = vpow2.f32 %v648_v15  ;;  %v646_v23 = vmul.f32 1.442695, %v628_v18  ;;  %v590_v24 = vmul.f32 2.0, %v275_v60  ;;  %v585_v25 = vmul.f32 2.0, %v1123_v14 }
 0x113   :  { %v576_v27 = vadd.f32 %v1629_v63, %v354_v10  ;;  %1180 = vpow2.f32 %v664_v17  ;;  %v631_v16 = vmul.f32 -0.0625, %v615_v20  ;;  %v623_v28 = vmax.f32 %v607_v21, 0.0 }
 0x114   :  { %1182 = vpow2.f32 %v646_v23  ;;  %v598_v29 = vsub.f32 %v1645_v11, %v582_v22  ;;  %v606_v30 = vsub.f32 %v1660_v4, %v590_v24  ;;  %v601_v31 = vsub.f32 %v1648_v12, %v585_v25 }
 0x115   :  { %v662_v26 = vmul.f32 1.442695, %v636_v19  ;;  %v652_v34 = vmul.f32 1.442695, %v631_v16  ;;  %v639_v35 = vmul.f32 -0.0625, %v623_v28  ;;  %v593_v36 = vmul.f32 2.0, %v1135_v5 }
 0x116   :  { %v614_v37 = vmax.f32 %v598_v29, 0.0  ;;  %v622_v38 = vmax.f32 %v606_v30, 0.0  ;;  %v617_v39 = vmax.f32 %v601_v31, 0.0  ;;  %v584_v63 = vmul.f32 2.0, %v245_v9 }
 0x117   :  { %1184 = vpow2.f32 %v652_v34  ;;  %v668_v42 = vmul.f32 1.442695, %v639_v35  ;;  %v609_v44 = vsub.f32 %v1663_v33, %v593_v36  ;;  %v592_v40 = vmul.f32 2.0, %v285_v32 }
 0x118   :  { %v630_v46 = vmul.f32 -0.0625, %v614_v37  ;;  %v638_v11 = vmul.f32 -0.0625, %v622_v38  ;;  %v633_v47 = vmul.f32 -0.0625, %v617_v39  ;;  %v600_v4 = vsub.f32 %v1652_v3, %v584_v63 }
 0x119   :  { %1186 = vpow2.f32 %v662_v26  ;;  %v625_v12 = vmax.f32 %v609_v44, 0.0  ;;  %v608_v48 = vsub.f32 %v576_v27, %v592_v40  ;;  %v1677_v49 = vsel %vm904_vm1, 1.0, %v1637_v61 }
 0x11a   :  { %v1171_v50 = vpop.eup %1170  ;;  %1188 = vpow2.f32 %v668_v42  ;;  %v650_v52 = vmul.f32 1.442695, %v630_v46  ;;  %v666_v53 = vmul.f32 1.442695, %v638_v11  ;;  %v656_v54 = vmul.f32 1.442695, %v633_v47 }
 0x11b   :  { %v1173_v33 = vpop.eup %1172  ;;  %v641_v55 = vmul.f32 -0.0625, %v625_v12  ;;  %v616_v45 = vmax.f32 %v600_v4, 0.0  ;;  %v624_v56 = vmax.f32 %v608_v48, 0.0  ;;  %v675_v57 = vmul.f32 %v1171_v50, %v1171_v50 }
 0x11c   :  { %v1175_v58 = vpop.eup %1174  ;;  %1190 = vpow2.f32 %v650_v52  ;;  %v909_v3 = vmul.f32 -1.0, %v1677_v49  ;;  %v683_v59 = vmul.f32 %v1173_v33, %v1173_v33  ;;  %v1681_v6 = vmul.f32 0.0, %v1677_v49 }
 0x11d   :  { %v1177_v60 = vpop.eup %1176  ;;  %1192 = vpow2.f32 %v666_v53  ;;  %v672_v41 = vmul.f32 1.442695, %v641_v55  ;;  %v632_v61 = vmul.f32 -0.0625, %v616_v45  ;;  %v640_v62 = vmul.f32 -0.0625, %v624_v56 }
 0x11e   :  { %1194 = vpow2.f32 %v656_v54  ;;  %v691_v0 = vadd.f32 %v1171_v50, %v675_v57  ;;  %v707_v51 = vmul.f32 %v675_v57, %v675_v57  ;;  %v674_v1 = vmul.f32 %v1175_v58, %v1175_v58 }
 0x11f   :  { %v1179_v43 = vpop.eup %1178  ;;  %1196 = vpow2.f32 %v672_v41  ;;  %v654_v2 = vmul.f32 1.442695, %v632_v61  ;;  %v699_v7 = vadd.f32 %v1173_v33, %v683_v59  ;;  %v715_v19 = vmul.f32 %v683_v59, %v683_v59 }
 0x120   :  { %v1683_v13 = vpop.eup %1180  ;;  %v723_v14 = vadd.f32 %v707_v51, %v691_v0  ;;  %v739_v10 = vmul.f32 %v707_v51, %v707_v51  ;;  %v690_v15 = vadd.f32 %v1175_v58, %v674_v1  ;;  %v706_v17 = vmul.f32 %v674_v1, %v674_v1 }
 0x121   :  { %v1183_v18 = vpop.eup %1182  ;;  %1198 = vpow2.f32 %v654_v2  ;;  %v677_v5 = vmul.f32 %v1179_v43, %v1179_v43  ;;  %v682_v20 = vmul.f32 %v1177_v60, %v1177_v60  ;;  %v670_v21 = vmul.f32 1.442695, %v640_v62 }
 0x122   :  { %v755_v22 = vadd.f32 %v739_v10, %v723_v14  ;;  %v771_v23 = vmul.f32 %v739_v10, %v739_v10  ;;  %v722_v24 = vadd.f32 %v706_v17, %v690_v15  ;;  %v738_v25 = vmul.f32 %v706_v17, %v706_v17 }
 0x123   :  { %v693_v27 = vadd.f32 %v1179_v43, %v677_v5  ;;  %v709_v16 = vmul.f32 %v677_v5, %v677_v5  ;;  %v676_v28 = vmul.f32 %v1183_v18, %v1183_v18  ;;  %v731_v30 = vadd.f32 %v715_v19, %v699_v7 }
 0x124   :  { %v1185_v9 = vpop.eup %1184  ;;  %v787_v29 = vadd.f32 %v771_v23, %v755_v22  ;;  %v747_v31 = vmul.f32 %v715_v19, %v715_v19  ;;  %v698_v32 = vadd.f32 %v1177_v60, %v682_v20  ;;  %v754_v26 = vadd.f32 %v738_v25, %v722_v24 }
 0x125   :  { %v770_v34 = vmul.f32 %v738_v25, %v738_v25  ;;  %v725_v35 = vadd.f32 %v709_v16, %v693_v27  ;;  %v741_v36 = vmul.f32 %v709_v16, %v709_v16  ;;  %v692_v39 = vadd.f32 %v1183_v18, %v676_v28 }
 0x126   :  { %v1685_v37 = vpop.eup %1186  ;;  %v925_v38 = vmul.f32 %v909_v3, %v787_v29  ;;  %v708_v63 = vmul.f32 %v676_v28, %v676_v28  ;;  %v679_v42 = vmul.f32 %v1185_v9, %v1185_v9  ;;  %v763_v47 = vadd.f32 %v747_v31, %v731_v30 }
 0x127   :  { %v1687_v44 = vpop.eup %1188  ;;  %v786_v40 = vadd.f32 %v770_v34, %v754_v26  ;;  %v757_v46 = vadd.f32 %v741_v36, %v725_v35  ;;  %v773_v11 = vmul.f32 %v741_v36, %v741_v36  ;;  %v779_v33 = vmul.f32 %v747_v31, %v747_v31 }
 0x128   :  { %942 = vadd.xlane.f32.xlu1 %v925_v38  ;;  %v724_v4 = vadd.f32 %v708_v63, %v692_v39  ;;  %v740_v12 = vmul.f32 %v708_v63, %v708_v63  ;;  %v695_v48 = vadd.f32 %v1185_v9, %v679_v42  ;;  %v711_v50 = vmul.f32 %v679_v42, %v679_v42 }
 0x129   :  { %v1191_v52 = vpop.eup %1190  ;;  %v924_v53 = vmul.f32 %v1677_v49, %v786_v40  ;;  %v789_v54 = vadd.f32 %v773_v11, %v757_v46  ;;  %v714_v55 = vmul.f32 %v682_v20, %v682_v20  ;;  %1200 = vpow2.f32 %v670_v21 }
 0x12a   :  { %v1690_v45 = vpop.eup %1192  ;;  %v756_v56 = vadd.f32 %v740_v12, %v724_v4  ;;  %v772_v57 = vmul.f32 %v740_v12, %v740_v12  ;;  %v727_v58 = vadd.f32 %v711_v50, %v695_v48  ;;  %v743_v3 = vmul.f32 %v711_v50, %v711_v50 }
 0x12b   :  { %v1195_v59 = vpop.eup %1194  ;;  %940 = vadd.xlane.f32.xlu0 %v924_v53  ;;  %v927_v60 = vmul.f32 %v1681_v6, %v789_v54  ;;  %v678_v41 = vmul.f32 %v1191_v52, %v1191_v52  ;;  %v730_v61 = vadd.f32 %v714_v55, %v698_v32  ;;  %v795_v7 = vadd.f32 %v779_v33, %v763_v47 }
 0x12c   :  { %v1693_v62 = vpop.eup %1196  ;;  %v788_v0 = vadd.f32 %v772_v57, %v756_v56  ;;  %v759_v49 = vadd.f32 %v743_v3, %v727_v58  ;;  %v775_v51 = vmul.f32 %v743_v3, %v743_v3  ;;  %v681_v1 = vmul.f32 %v1195_v59, %v1195_v59 }
 0x12d   :  { %946 = vadd.xlane.f32.xlu1 %v927_v60  ;;  %v694_v43 = vadd.f32 %v1191_v52, %v678_v41  ;;  %v710_v2 = vmul.f32 %v678_v41, %v678_v41  ;;  %v746_v14 = vmul.f32 %v714_v55, %v714_v55  ;;  %v933_v32 = vmul.f32 %v1681_v6, %v795_v7 }
 0x12e   :  { %v1199_v10 = vpop.eup %1198  ;;  %v926_v15 = vmul.f32 %v1681_v6, %v788_v0  ;;  %v791_v17 = vadd.f32 %v775_v51, %v759_v49  ;;  %v697_v18 = vadd.f32 %v1195_v59, %v681_v1  ;;  %v713_v5 = vmul.f32 %v681_v1, %v681_v1 }
 0x12f   :  { %v726_v19 = vadd.f32 %v710_v2, %v694_v43  ;;  %v742_v20 = vmul.f32 %v710_v2, %v710_v2  ;;  %v680_v21 = vmul.f32 %v1199_v10, %v1199_v10  ;;  %v762_v22 = vadd.f32 %v746_v14, %v730_v61 }
 0x130   :  { %944 = vadd.xlane.f32.xlu0 %v926_v15  ;;  %v929_v23 = vmul.f32 %v1681_v6, %v791_v17  ;;  %v729_v24 = vadd.f32 %v713_v5, %v697_v18  ;;  %v745_v25 = vmul.f32 %v713_v5, %v713_v5  ;;  %v778_v27 = vmul.f32 %v746_v14, %v746_v14 }
 0x131   :  { %v758_v16 = vadd.f32 %v742_v20, %v726_v19  ;;  %v774_v28 = vmul.f32 %v742_v20, %v742_v20  ;;  %v696_v9 = vadd.f32 %v1199_v10, %v680_v21  ;;  %v712_v29 = vmul.f32 %v680_v21, %v680_v21 }
 0x132   :  { %950 = vadd.xlane.f32.xlu1 %v929_v23  ;;  %v761_v30 = vadd.f32 %v745_v25, %v729_v24  ;;  %v777_v31 = vmul.f32 %v745_v25, %v745_v25  ;;  %v685_v26 = vmul.f32 %v1683_v13, %v1683_v13  ;;  %v684_v38 = vmul.f32 %v1685_v37, %v1685_v37 }
 0x133   :  { %v790_v34 = vadd.f32 %v774_v28, %v758_v16  ;;  %v728_v35 = vadd.f32 %v712_v29, %v696_v9  ;;  %v744_v36 = vmul.f32 %v712_v29, %v712_v29  ;;  %v794_v63 = vadd.f32 %v778_v27, %v762_v22 }
 0x134   :  { %v793_v39 = vadd.f32 %v777_v31, %v761_v30  ;;  %v701_v42 = vadd.f32 %v1683_v13, %v685_v26  ;;  %v717_v40 = vmul.f32 %v685_v26, %v685_v26  ;;  %v700_v4 = vadd.f32 %v1685_v37, %v684_v38 }
 0x135   :  { %v928_v46 = vmul.f32 %v1681_v6, %v790_v34  ;;  %v760_v11 = vadd.f32 %v744_v36, %v728_v35  ;;  %v776_v47 = vmul.f32 %v744_v36, %v744_v36  ;;  %v716_v52 = vmul.f32 %v684_v38, %v684_v38 }
 0x136   :  { %v931_v12 = vmul.f32 %v1681_v6, %v793_v39  ;;  %v733_v48 = vadd.f32 %v717_v40, %v701_v42  ;;  %v749_v50 = vmul.f32 %v717_v40, %v717_v40  ;;  %v687_v54 = vmul.f32 %v1687_v44, %v1687_v44  ;;  %v1201_v55 = vpop.eup %1200 }
 0x137   :  { %948 = vadd.xlane.f32.xlu0 %v928_v46  ;;  %v792_v53 = vadd.f32 %v776_v47, %v760_v11  ;;  %v686_v13 = vmul.f32 %v1690_v45, %v1690_v45  ;;  %v689_v33 = vmul.f32 %v1693_v62, %v1693_v62  ;;  %v732_v57 = vadd.f32 %v716_v52, %v700_v4 }
 0x138   :  { %954 = vadd.xlane.f32.xlu1 %v931_v12  ;;  %v765_v56 = vadd.f32 %v749_v50, %v733_v48  ;;  %v781_v37 = vmul.f32 %v749_v50, %v749_v50  ;;  %v748_v58 = vmul.f32 %v716_v52, %v716_v52  ;;  %v703_v59 = vadd.f32 %v1687_v44, %v687_v54 }
 0x139   :  { %v930_v3 = vmul.f32 %v1681_v6, %v792_v53  ;;  %v719_v60 = vmul.f32 %v687_v54, %v687_v54  ;;  %v702_v41 = vadd.f32 %v1690_v45, %v686_v13  ;;  %v718_v51 = vmul.f32 %v686_v13, %v686_v13 }
 0x13a   :  { %v797_v61 = vadd.f32 %v781_v37, %v765_v56  ;;  %v764_v0 = vadd.f32 %v748_v58, %v732_v57  ;;  %v780_v49 = vmul.f32 %v748_v58, %v748_v58  ;;  %v705_v2 = vadd.f32 %v1693_v62, %v689_v33 }
 0x13b   :  { %952 = vadd.xlane.f32.xlu0 %v930_v3  ;;  %v735_v1 = vadd.f32 %v719_v60, %v703_v59  ;;  %v751_v43 = vmul.f32 %v719_v60, %v719_v60  ;;  %v721_v7 = vmul.f32 %v689_v33, %v689_v33  ;;  %v932_v14 = vmul.f32 %v1681_v6, %v794_v63 }
 0x13c   :  { %958 = vadd.xlane.f32.xlu1 %v933_v32  ;;  %v796_v10 = vadd.f32 %v780_v49, %v764_v0  ;;  %v734_v15 = vadd.f32 %v718_v51, %v702_v41  ;;  %v750_v17 = vmul.f32 %v718_v51, %v718_v51  ;;  %v935_v19 = vmul.f32 %v1681_v6, %v797_v61 }
 0x13d   :  { %v767_v44 = vadd.f32 %v751_v43, %v735_v1  ;;  %v783_v18 = vmul.f32 %v751_v43, %v751_v43  ;;  %v737_v5 = vadd.f32 %v721_v7, %v705_v2  ;;  %v753_v45 = vmul.f32 %v721_v7, %v721_v7 }
 0x13e   :  { %v766_v20 = vadd.f32 %v750_v17, %v734_v15  ;;  %v782_v21 = vmul.f32 %v750_v17, %v750_v17  ;;  %v688_v22 = vmul.f32 %v1201_v55, %v1201_v55  ;;  %v934_v16 = vmul.f32 %v1681_v6, %v796_v10  ;;  %v993_v10 = vld [vmem:[#allocation2] sm:$0x1] }
 0x13f   :  { %956 = vadd.xlane.f32.xlu0 %v932_v14  ;;  %v799_v23 = vadd.f32 %v783_v18, %v767_v44  ;;  %v769_v24 = vadd.f32 %v753_v45, %v737_v5  ;;  %v785_v62 = vmul.f32 %v753_v45, %v753_v45 }
 0x140   :  { %962 = vadd.xlane.f32.xlu1 %v935_v19  ;;  %v704_v25 = vadd.f32 %v1201_v55, %v688_v22  ;;  %v720_v27 = vmul.f32 %v688_v22, %v688_v22  ;;  %v798_v28 = vadd.f32 %v782_v21, %v766_v20 }
 0x141   :  { %v937_v9 = vmul.f32 %v1681_v6, %v799_v23  ;;  %v801_v29 = vadd.f32 %v785_v62, %v769_v24 }
 0x142   :  { %v736_v30 = vadd.f32 %v720_v27, %v704_v25  ;;  %v752_v31 = vmul.f32 %v720_v27, %v720_v27  ;;  %v936_v34 = vmul.f32 %v1681_v6, %v798_v28 }
 0x143   :  { %960 = vadd.xlane.f32.xlu0 %v934_v16  ;;  %v939_v35 = vmul.f32 %v1681_v6, %v801_v29 }
 0x144   :  { %966 = vadd.xlane.f32.xlu1 %v937_v9  ;;  %v768_v32 = vadd.f32 %v752_v31, %v736_v30  ;;  %v784_v26 = vmul.f32 %v752_v31, %v752_v31 }
 0x146   :  { %v800_v36 = vadd.f32 %v784_v26, %v768_v32 }
 0x147   :  { %964 = vadd.xlane.f32.xlu0 %v936_v34 }
 0x148   :  { %970 = vadd.xlane.f32.xlu1 %v939_v35  ;;  %v938_v38 = vmul.f32 %v1681_v6, %v800_v36 }
 0x14b   :  { %968 = vadd.xlane.f32.xlu0 %v938_v38 }
 0x1b1   :  { %v943_v39 = vpop.xlane.xlu1 %942 }
 0x1b4   :  { %v941_v63 = vpop.xlane.xlu0 %940 }
 0x1b5   :  { %v972_v40 = vadd.f32 %v943_v39, %v941_v63 }
 0x1b6   :  { %v947_v42 = vpop.xlane.xlu1 %946 }
 0x1b9   :  { %v945_v46 = vpop.xlane.xlu0 %944 }
 0x1ba   :  { %v973_v11 = vadd.f32 %v972_v40, %v945_v46 }
 0x1bb   :  { %v951_v47 = vpop.xlane.xlu1 %950 }
 0x1bc   :  { %v974_v4 = vadd.f32 %v973_v11, %v947_v42 }
 0x1c0   :  { %v949_v12 = vpop.xlane.xlu0 %948 }
 0x1c1   :  { %v975_v48 = vadd.f32 %v974_v4, %v949_v12  ;;  %v955_v50 = vpop.xlane.xlu1 %954 }
 0x1c3   :  { %v976_v52 = vadd.f32 %v975_v48, %v951_v47 }
 0x1c4   :  { %v953_v53 = vpop.xlane.xlu0 %952 }
 0x1c5   :  { %v977_v54 = vadd.f32 %v976_v52, %v953_v53  ;;  %v959_v6 = vpop.xlane.xlu1 %958 }
 0x1c7   :  { %v978_v13 = vadd.f32 %v977_v54, %v955_v50 }
 0x1c8   :  { %v957_v33 = vpop.xlane.xlu0 %956 }
 0x1c9   :  { %v979_v55 = vadd.f32 %v978_v13, %v957_v33  ;;  %v963_v56 = vpop.xlane.xlu1 %962 }
 0x1cb   :  { %v980_v8 = vadd.f32 %v979_v55, %v959_v6 }
 0x1cc   :  { %v961_v37 = vpop.xlane.xlu0 %960 }
 0x1cd   :  { %v981_v57 = vadd.f32 %v980_v8, %v961_v37  ;;  %v967_v3 = vpop.xlane.xlu1 %966 }
 0x1cf   :  { %v982_v58 = vadd.f32 %v981_v57, %v963_v56 }
 0x1d0   :  { %v965_v59 = vpop.xlane.xlu0 %964 }
 0x1d1   :  { %v983_v60 = vadd.f32 %v982_v58, %v965_v59  ;;  %v971_v49 = vpop.xlane.xlu1 %970 }
 0x1d3   :  { %v984_v41 = vadd.f32 %v983_v60, %v967_v3 }
 0x1d4   :  { %v969_v61 = vpop.xlane.xlu0 %968 }
 0x1d5   :  { %v985_v0 = vadd.f32 %v984_v41, %v969_v61 }
 0x1d7   :  { %v986_v51 = vadd.f32 %v985_v0, %v971_v49 }
 0x1d9   :  { %v987_v1 = vrot.slane %v986_v51, 4 }
 0x1db   :  { %v988_v43 = vadd.f32 %v987_v1, %v986_v51 }
 0x1dd   :  { %v989_v2 = vrot.slane %v988_v43, 2 }
 0x1df   :  { %v990_v7 = vadd.f32 %v989_v2, %v988_v43 }
 0x1e1   :  { %v991_v14 = vrot.slane %v990_v7, 1 }
 0x1e3   :  { %v992_v15 = vadd.f32 %v991_v14, %v990_v7 }
 0x1e5   :  { %v994_v17 = vadd.f32 %v993_v10, %v992_v15 }
 0x1e7   :  { %996 = vst.msk [vmem:[#allocation2] sm:$0x1] %vm18_vm2, %v994_v17 }
 0x1ee   :  { %v999_v44 = vld [vmem:[#allocation2] sm:$0x1] }
 0x1ef   :  { %v1000_v18 = vmul.f32 0.015625, %v999_v44 }
 0x1f1   :  { %1001 = vst.msk [vmem:[#allocation2] sm:$0x1] %vm18_vm2, %v1000_v18 }
 0x1f2   :  { %1213 = shalt.err (!%p1210_p4)
}
 0x1f3   :  { %1011 = dma.vmem_to_hbm [thread:$0]  %s1009_s16, 16, %s1732_s2, [#allocation3]  }
 0x1f4   :  { %1222 = dma.done.wait [#allocation3], 16  }
 0x1f5   :  { %1223 = vsyncadd [#allocation3], 4294967280 }
 0x1f6   :  { %1015 = vsyncpa [#allocation3], 1 }

</bundles_post_ra>
